<compile_context>
chip_gen: v7x
topology: tpu7x:2x2x1
jax: 0.10.0
libtpu: 0.0.40
codegen_flags: <defaults>
</compile_context>

<pallas_src>
import functools

import numpy as np
import jax
import jax.numpy as jnp
from jax.experimental import pallas as pl
from jax.experimental.pallas import tpu as pltpu

SQRT2 = float(np.sqrt(2.0))
# pywt.Wavelet('db1').rec_lo / rec_hi
DB1_REC_LO = np.array([1.0 / SQRT2, 1.0 / SQRT2], dtype=np.float64)
DB1_REC_HI = np.array([1.0 / SQRT2, -1.0 / SQRT2], dtype=np.float64)


# ---------------------------------------------------------------------------
# Constant "combine + interleave" matrices for the db1 (Haar) synthesis bank.
# ---------------------------------------------------------------------------
def _row_synthesis_matrix(tw):
    """(2*tw, 2*tw) matrix R with  [lo | hi] @ R == row-synthesised, W-interleaved
    output.  Both 1/sqrt(2) filter scalings (column and row pass) are folded in
    here, so the in-kernel column combine is a pure VPU add/sub."""
    r = np.zeros((2 * tw, 2 * tw), dtype=np.float32)
    for j in range(tw):
        r[j, 2 * j] = 0.5           # lo -> even output column
        r[j, 2 * j + 1] = 0.5       # lo -> odd  output column
        r[tw + j, 2 * j] = 0.5      # hi -> even output column
        r[tw + j, 2 * j + 1] = -0.5  # hi -> odd  output column
    return r


def _row_interleave_matrix(th):
    """(2*th, 2*th) permutation P with  P @ [even_rows ; odd_rows] == interleaved."""
    p = np.zeros((2 * th, 2 * th), dtype=np.float32)
    for i in range(th):
        p[2 * i, i] = 1.0
        p[2 * i + 1, th + i] = 1.0
    return p


# ---------------------------------------------------------------------------
# Pallas kernel: one block of B planes x one W-stripe of the db1 inverse bank.
# ---------------------------------------------------------------------------
def _haar_sfb2d_kernel(ll_ref, h_ref, rw_ref, rh_ref, out_ref, *, tw, th):
    """
    ll_ref : (B, Hp, Wb)      lowpass coefficients
    h_ref  : (B, 3, Hp, Wb)   (lh, hl, hh) highpass coefficients
    rw_ref : (2*tw, 2*tw)     row-synthesis + W-interleave constant
    rh_ref : (2*th, 2*th)     H-interleave permutation constant
    out_ref: (B, 2*Hp, 2*Wb)
    """
    B, Hp, Wb = ll_ref.shape
    n_wt = Wb // tw
    n_ht = Hp // th
    rw = rw_ref[...]   # hoisted: loaded once, reused by every tile matmul
    rh = rh_ref[...]
    for b in range(B):
        for t in range(n_wt):
            c0 = t * tw
            ll = ll_ref[b, :, c0:c0 + tw]
            lh = h_ref[b, 0, :, c0:c0 + tw]
            hl = h_ref[b, 1, :, c0:c0 + tw]
            hh = h_ref[b, 2, :, c0:c0 + tw]
            # Column (H) Haar combine on the VPU (filter scaling folded into rw).
            xe = jnp.concatenate([ll + lh, hl + hh], axis=1)   # even output rows
            xo = jnp.concatenate([ll - lh, hl - hh], axis=1)   # odd  output rows
            # Row (W) synthesis + W-interleave: one K=2*tw MXU pass per parity.
            ye = jnp.dot(xe, rw, preferred_element_type=jnp.float32)  # (Hp, 2*tw)
            yo = jnp.dot(xo, rw, preferred_element_type=jnp.float32)
            # H-interleave via a banded permutation matmul (K = 2*th <= 128).
            for r in range(n_ht):
                r0 = r * th
                z = jnp.concatenate([ye[r0:r0 + th, :], yo[r0:r0 + th, :]],
                                    axis=0)                       # (2*th, 2*tw)
                blk = jnp.dot(rh, z, preferred_element_type=jnp.float32)
                out_ref[b, 2 * r0:2 * r0 + 2 * th,
                        2 * c0:2 * c0 + 2 * tw] = blk.astype(out_ref.dtype)


# ---------------------------------------------------------------------------
# Block / tile sizing (generation-aware VMEM budgeting).
# ---------------------------------------------------------------------------
def _vmem_budget_bytes():
    cap = None
    try:
        cap = int(getattr(pltpu.get_tpu_info(), "vmem_capacity_bytes", 0)) or None
    except Exception:
        cap = None
    if cap is None:
        cap = 64 * 1024 * 1024              # conservative: v7x has 64 MiB / TC
    working = cap // 3                      # working-set budget for block sizing
    limit = min((cap * 3) // 4, 96 * 1024 * 1024)  # scoped VMEM limit w/ headroom
    return working, limit


def _pick_tile(n, cap=64):
    """Largest divisor of n that is <= cap (K of the banded matmuls = 2*tile)."""
    if n <= cap:
        return n
    best = 1
    for d in range(1, cap + 1):
        if n % d == 0:
            best = d
    # TODO(synk): awkward (e.g. prime) sizes fall back to an un-banded matrix.
    return best if best >= 16 else n


def sfb2d_haar_pallas(ll, h):
    """One level of the db1 separable synthesis filter bank (mode='zero')."""
    N, C, Hp, Wp = ll.shape
    assert h.shape == (N, C, 3, Hp, Wp)
    nc = N * C
    dt = ll.dtype
    itemsize = np.dtype(dt).itemsize
    Hout, Wout = 2 * Hp, 2 * Wp

    working, vmem_limit = _vmem_budget_bytes()

    # Per-plane, per-stripe DMA bytes (in + out, double-buffered by BlockSpec).
    def plane_bytes(wb):
        return 2 * (4 * Hp * wb + 4 * Hp * wb) * itemsize

    # Inner W-stripe so even a single plane fits the VMEM budget (v7x fallback);
    # stripes stay multiples of 128 lanes -> unmasked, aligned stores.
    Wb = Wp
    while plane_bytes(Wb) > working and Wb % 256 == 0:
        Wb //= 2

    tw = _pick_tile(Wb)
    th = _pick_tile(Hp)

    # Planes per grid step: as many as fit the budget, but keep >= 4 grid steps
    # (pipelining + both v7x TensorCores) and bound in-kernel unrolling.
    fixed = 2 * 4 * ((2 * tw) ** 2 + (2 * th) ** 2)            # rw/rh, 2 buffers
    fixed += 4 * (4 * Hp * 2 * tw + 3 * (2 * th) * (2 * tw))   # live f32 values
    avail = max(working - fixed, plane_bytes(Wb))
    B = int(max(1, min(nc, avail // plane_bytes(Wb), 64, max(1, nc // 4))))
    while nc % B:
        B -= 1

    rw = jnp.asarray(_row_synthesis_matrix(tw))
    rh = jnp.asarray(_row_interleave_matrix(th))
    ll3 = ll.reshape(nc, Hp, Wp)          # free reshapes (no repacking in HBM)
    h4 = h.reshape(nc, 3, Hp, Wp)

    out = pl.pallas_call(
        functools.partial(_haar_sfb2d_kernel, tw=tw, th=th),
        out_shape=jax.ShapeDtypeStruct((nc, Hout, Wout), dt),
        grid=(nc // B, Wp // Wb),
        in_specs=[
            pl.BlockSpec((B, Hp, Wb), lambda i, j: (i, 0, j)),
            pl.BlockSpec((B, 3, Hp, Wb), lambda i, j: (i, 0, 0, j)),
            pl.BlockSpec((2 * tw, 2 * tw), lambda i, j: (0, 0)),
            pl.BlockSpec((2 * th, 2 * th), lambda i, j: (0, 0)),
        ],
        out_specs=pl.BlockSpec((B, Hout, 2 * Wb), lambda i, j: (i, 0, j)),
        compiler_params=pltpu.CompilerParams(
            dimension_semantics=("parallel", "parallel"),
            vmem_limit_bytes=int(vmem_limit)),
    )(ll3, h4, rw, rh)

    return out.reshape(N, C, Hout, Wout)


# ---------------------------------------------------------------------------
# Plain jnp/XLA path for tiny (lane-sparse) pyramid levels.
# ---------------------------------------------------------------------------
def _sfb2d_haar_xla(ll, h):
    lh = h[:, :, 0]
    hl = h[:, :, 1]
    hh = h[:, :, 2]
    a = (ll + lh + hl + hh) * 0.5   # out[2i  , 2j  ]
    b = (ll + lh - hl - hh) * 0.5   # out[2i  , 2j+1]
    c = (ll - lh + hl - hh) * 0.5   # out[2i+1, 2j  ]
    d = (ll - lh - hl + hh) * 0.5   # out[2i+1, 2j+1]
    row_e = jnp.stack([a, b], axis=-1)
    row_o = jnp.stack([c, d], axis=-1)
    out = jnp.stack([row_e, row_o], axis=-3)       # (N, C, Hp, 2, Wp, 2)
    n_, c_, hp, wp = ll.shape
    return out.reshape(n_, c_, 2 * hp, 2 * wp).astype(ll.dtype)


class SWTInverse:
    """JAX/Pallas port of pytorch_wavelets SWTInverse.forward (2D inverse DWT)."""

    def __init__(self, wave='db1', mode='zero', separable=True,
                 pallas_min_wout=128):
        assert wave == 'db1' and mode == 'zero' and separable, (
            "only the db1 / mode='zero' / separable configuration is supported")
        self.g0_col = DB1_REC_LO
        self.g1_col = DB1_REC_HI
        self.g0_row = DB1_REC_LO
        self.g1_row = DB1_REC_HI
        self.mode = mode
        self.separable = separable
        # Levels with output width below this use the plain XLA path
        # (masked lane-sparse stores make a Pallas kernel pointless there).
        self.pallas_min_wout = pallas_min_wout

    def __call__(self, coeffs):
        yl, yh = coeffs
        ll = yl
        for h in yh[::-1]:
            if h is None:
                h = jnp.zeros((ll.shape[0], ll.shape[1], 3,
                               ll.shape[-2], ll.shape[-1]), ll.dtype)
            if ll.shape[-2] > h.shape[-2]:
                ll = ll[..., :-1, :]
            if ll.shape[-1] > h.shape[-1]:
                ll = ll[..., :-1]
            if 2 * ll.shape[-1] >= self.pallas_min_wout:
                ll = sfb2d_haar_pallas(ll, h)
            else:
                ll = _sfb2d_haar_xla(ll, h)
        return ll


# ------------------------- numpy reference (conv_transpose semantics) -------
def _np_conv_transpose_1d(x, g, axis):
    g = np.asarray(g, dtype=np.float64).ravel()
    L = g.shape[0]
    p = L - 2
    xm = np.moveaxis(np.asarray(x, dtype=np.float64), axis, -1)
    n = xm.shape[-1]
    out_len = 2 * n + 2 - L
    out = np.zeros(xm.shape[:-1] + (out_len,), dtype=np.float64)
    for m in range(out_len):
        for j in range(n):
            k = m + p - 2 * j
            if 0 <= k < L:
                out[..., m] += xm[..., j] * g[k]
    return np.moveaxis(out, -1, axis)


def _np_sfb1d(lo, hi, g0, g1, axis):
    return _np_conv_transpose_1d(lo, g0, axis) + _np_conv_transpose_1d(hi, g1, axis)


def _np_sfb2d(ll, lh, hl, hh, g0c, g1c, g0r, g1r):
    lo = _np_sfb1d(ll, lh, g0c, g1c, axis=-2)
    hi = _np_sfb1d(hl, hh, g0c, g1c, axis=-2)
    return _np_sfb1d(lo, hi, g0r, g1r, axis=-1)


def _np_inverse(yl, yh):
    ll = np.asarray(yl, dtype=np.float64)
    for h in yh[::-1]:
        h = np.asarray(h, dtype=np.float64)
        if ll.shape[-2] > h.shape[-2]:
            ll = ll[..., :-1, :]
        if ll.shape[-1] > h.shape[-1]:
            ll = ll[..., :-1]
        ll = _np_sfb2d(ll, h[:, :, 0], h[:, :, 1], h[:, :, 2],
                       DB1_REC_LO, DB1_REC_HI, DB1_REC_LO, DB1_REC_HI)
    return ll


if __name__ == "__main__":
    key = jax.random.PRNGKey(0)
    k1, k2, k3, k4, k5 = jax.random.split(key, 5)

    # Case 1: small two-level pyramid of a 16x16 image; force the Pallas path
    # (default dispatch would route these lane-sparse levels to XLA).
    N, C = 2, 4
    yl = jax.random.normal(k1, (N, C, 4, 4), dtype=jnp.float32)
    yh = [jax.random.normal(k2, (N, C, 3, 8, 8), dtype=jnp.float32),
          jax.random.normal(k3, (N, C, 3, 4, 4), dtype=jnp.float32)]
    inv_pallas = SWTInverse(wave='db1', mode='zero', separable=True,
                            pallas_min_wout=1)
    out = jax.block_until_ready(inv_pallas((yl, yh)))
    assert out.shape == (N, C, 16, 16), out.shape
    assert out.dtype == yl.dtype, out.dtype
    ref = _np_inverse(np.asarray(yl), [np.asarray(h) for h in yh])
    np.testing.assert_allclose(np.asarray(out), ref, rtol=1e-4, atol=1e-4)

    # Case 2: one level at 128x128 -> 256x256; default dispatch uses the Pallas
    # kernel and exercises the banded W/H tile loops and block sizing.
    N2, C2 = 1, 2
    yl2 = jax.random.normal(k4, (N2, C2, 128, 128), dtype=jnp.float32)
    yh2 = [jax.random.normal(k5, (N2, C2, 3, 128, 128), dtype=jnp.float32)]
    inv_default = SWTInverse(wave='db1', mode='zero', separable=True)
    out2 = jax.block_until_ready(inv_default((yl2, yh2)))
    assert out2.shape == (N2, C2, 256, 256), out2.shape
    ref2 = _np_inverse(np.asarray(yl2), [np.asarray(h) for h in yh2])
    np.testing.assert_allclose(np.asarray(out2), ref2, rtol=1e-4, atol=1e-4)

    print("KERNEL_OK")
</pallas_src>

<mosaic_0001>
module attributes {stable_mosaic.version = 11 : i64} {
  func.func @_haar_sfb2d_kernel(%arg0: i32, %arg1: i32, %arg2: memref<2x4x4xf32, #tpu.memory_space<vmem>>, %arg3: memref<2x3x4x4xf32, #tpu.memory_space<vmem>>, %arg4: memref<8x8xf32, #tpu.memory_space<vmem>>, %arg5: memref<8x8xf32, #tpu.memory_space<vmem>>, %arg6: memref<2x8x8xf32, #tpu.memory_space<vmem>>) attributes {dimension_semantics = [#tpu.dimension_semantics<parallel>, #tpu.dimension_semantics<parallel>], iteration_bounds = array<i64: 4, 1>, scalar_prefetch = 0 : i64, scratch_operands = 0 : i64, tpu.core_type = #tpu.core_type<tc>, window_params = [{transform_indices = @transform_0, window_bounds = array<i64: 2, 4, 4>}, {transform_indices = @transform_1, window_bounds = array<i64: 2, 3, 4, 4>}, {pipeline_mode = #tpu.pipeline_mode<synchronous>, transform_indices = @transform_2, window_bounds = array<i64: 8, 8>}, {pipeline_mode = #tpu.pipeline_mode<synchronous>, transform_indices = @transform_3, window_bounds = array<i64: 8, 8>}, {transform_indices = @transform_4, window_bounds = array<i64: 2, 8, 8>}]} {
    %c0 = arith.constant 0 : index
    %c0_0 = arith.constant 0 : index
    %0 = vector.load %arg4[%c0, %c0_0] : memref<8x8xf32, #tpu.memory_space<vmem>>, vector<8x8xf32>
    %c0_1 = arith.constant 0 : index
    %c0_2 = arith.constant 0 : index
    %1 = vector.load %arg5[%c0_1, %c0_2] : memref<8x8xf32, #tpu.memory_space<vmem>>, vector<8x8xf32>
    %c0_3 = arith.constant 0 : index
    %c0_4 = arith.constant 0 : index
    %c0_5 = arith.constant 0 : index
    %2 = vector.load %arg2[%c0_3, %c0_4, %c0_5] : memref<2x4x4xf32, #tpu.memory_space<vmem>>, vector<1x4x4xf32>
    %3 = vector.shape_cast %2 : vector<1x4x4xf32> to vector<4x4xf32>
    %c0_6 = arith.constant 0 : index
    %c0_7 = arith.constant 0 : index
    %c0_8 = arith.constant 0 : index
    %c0_9 = arith.constant 0 : index
    %4 = vector.load %arg3[%c0_6, %c0_7, %c0_8, %c0_9] : memref<2x3x4x4xf32, #tpu.memory_space<vmem>>, vector<1x1x4x4xf32>
    %5 = vector.shape_cast %4 : vector<1x1x4x4xf32> to vector<4x4xf32>
    %c0_10 = arith.constant 0 : index
    %c1 = arith.constant 1 : index
    %c0_11 = arith.constant 0 : index
    %c0_12 = arith.constant 0 : index
    %6 = vector.load %arg3[%c0_10, %c1, %c0_11, %c0_12] : memref<2x3x4x4xf32, #tpu.memory_space<vmem>>, vector<1x1x4x4xf32>
    %7 = vector.shape_cast %6 : vector<1x1x4x4xf32> to vector<4x4xf32>
    %c0_13 = arith.constant 0 : index
    %c2 = arith.constant 2 : index
    %c0_14 = arith.constant 0 : index
    %c0_15 = arith.constant 0 : index
    %8 = vector.load %arg3[%c0_13, %c2, %c0_14, %c0_15] : memref<2x3x4x4xf32, #tpu.memory_space<vmem>>, vector<1x1x4x4xf32>
    %9 = vector.shape_cast %8 : vector<1x1x4x4xf32> to vector<4x4xf32>
    %10 = arith.addf %3, %5 : vector<4x4xf32>
    %11 = arith.addf %7, %9 : vector<4x4xf32>
    %12 = tpu.concatenate %10, %11 in 1 : vector<4x4xf32>, vector<4x4xf32> -> vector<4x8xf32>
    %13 = arith.subf %3, %5 : vector<4x4xf32>
    %14 = arith.subf %7, %9 : vector<4x4xf32>
    %15 = tpu.concatenate %13, %14 in 1 : vector<4x4xf32>, vector<4x4xf32> -> vector<4x8xf32>
    %cst = arith.constant dense<0.000000e+00> : vector<4x8xf32>
    %16 = tpu.matmul %12, %0, %cst {dimension_numbers = #tpu.dot_dimension_numbers<[1], [0], [0], [1], [0, 0, 1, 1], [], []>} : vector<4x8xf32>, vector<8x8xf32>, vector<4x8xf32> -> vector<4x8xf32>
    %cst_16 = arith.constant dense<0.000000e+00> : vector<4x8xf32>
    %17 = tpu.matmul %15, %0, %cst_16 {dimension_numbers = #tpu.dot_dimension_numbers<[1], [0], [0], [1], [0, 0, 1, 1], [], []>} : vector<4x8xf32>, vector<8x8xf32>, vector<4x8xf32> -> vector<4x8xf32>
    %18 = tpu.concatenate %16, %17 in 0 : vector<4x8xf32>, vector<4x8xf32> -> vector<8x8xf32>
    %cst_17 = arith.constant dense<0.000000e+00> : vector<8x8xf32>
    %19 = tpu.matmul %1, %18, %cst_17 {dimension_numbers = #tpu.dot_dimension_numbers<[1], [0], [0], [1], [0, 0, 1, 1], [], []>} : vector<8x8xf32>, vector<8x8xf32>, vector<8x8xf32> -> vector<8x8xf32>
    %c0_18 = arith.constant 0 : index
    %c0_19 = arith.constant 0 : index
    %c0_20 = arith.constant 0 : index
    %20 = vector.load %arg6[%c0_18, %c0_19, %c0_20] : memref<2x8x8xf32, #tpu.memory_space<vmem>>, vector<1x8x8xf32>
    %21 = vector.shape_cast %20 : vector<1x8x8xf32> to vector<8x8xf32>
    %22 = vector.shape_cast %19 : vector<8x8xf32> to vector<1x8x8xf32>
    tpu.vector_store %arg6[%c0_18, %c0_19, %c0_20], %22 {strides = array<i32>} : memref<2x8x8xf32, #tpu.memory_space<vmem>>, vector<1x8x8xf32>,
    %c1_21 = arith.constant 1 : index
    %c0_22 = arith.constant 0 : index
    %c0_23 = arith.constant 0 : index
    %23 = vector.load %arg2[%c1_21, %c0_22, %c0_23] : memref<2x4x4xf32, #tpu.memory_space<vmem>>, vector<1x4x4xf32>
    %24 = vector.shape_cast %23 : vector<1x4x4xf32> to vector<4x4xf32>
    %c1_24 = arith.constant 1 : index
    %c0_25 = arith.constant 0 : index
    %c0_26 = arith.constant 0 : index
    %c0_27 = arith.constant 0 : index
    %25 = vector.load %arg3[%c1_24, %c0_25, %c0_26, %c0_27] : memref<2x3x4x4xf32, #tpu.memory_space<vmem>>, vector<1x1x4x4xf32>
    %26 = vector.shape_cast %25 : vector<1x1x4x4xf32> to vector<4x4xf32>
    %c1_28 = arith.constant 1 : index
    %c1_29 = arith.constant 1 : index
    %c0_30 = arith.constant 0 : index
    %c0_31 = arith.constant 0 : index
    %27 = vector.load %arg3[%c1_28, %c1_29, %c0_30, %c0_31] : memref<2x3x4x4xf32, #tpu.memory_space<vmem>>, vector<1x1x4x4xf32>
    %28 = vector.shape_cast %27 : vector<1x1x4x4xf32> to vector<4x4xf32>
    %c1_32 = arith.constant 1 : index
    %c2_33 = arith.constant 2 : index
    %c0_34 = arith.constant 0 : index
    %c0_35 = arith.constant 0 : index
    %29 = vector.load %arg3[%c1_32, %c2_33, %c0_34, %c0_35] : memref<2x3x4x4xf32, #tpu.memory_space<vmem>>, vector<1x1x4x4xf32>
    %30 = vector.shape_cast %29 : vector<1x1x4x4xf32> to vector<4x4xf32>
    %31 = arith.addf %24, %26 : vector<4x4xf32>
    %32 = arith.addf %28, %30 : vector<4x4xf32>
    %33 = tpu.concatenate %31, %32 in 1 : vector<4x4xf32>, vector<4x4xf32> -> vector<4x8xf32>
    %34 = arith.subf %24, %26 : vector<4x4xf32>
    %35 = arith.subf %28, %30 : vector<4x4xf32>
    %36 = tpu.concatenate %34, %35 in 1 : vector<4x4xf32>, vector<4x4xf32> -> vector<4x8xf32>
    %cst_36 = arith.constant dense<0.000000e+00> : vector<4x8xf32>
    %37 = tpu.matmul %33, %0, %cst_36 {dimension_numbers = #tpu.dot_dimension_numbers<[1], [0], [0], [1], [0, 0, 1, 1], [], []>} : vector<4x8xf32>, vector<8x8xf32>, vector<4x8xf32> -> vector<4x8xf32>
    %cst_37 = arith.constant dense<0.000000e+00> : vector<4x8xf32>
    %38 = tpu.matmul %36, %0, %cst_37 {dimension_numbers = #tpu.dot_dimension_numbers<[1], [0], [0], [1], [0, 0, 1, 1], [], []>} : vector<4x8xf32>, vector<8x8xf32>, vector<4x8xf32> -> vector<4x8xf32>
    %39 = tpu.concatenate %37, %38 in 0 : vector<4x8xf32>, vector<4x8xf32> -> vector<8x8xf32>
    %cst_38 = arith.constant dense<0.000000e+00> : vector<8x8xf32>
    %40 = tpu.matmul %1, %39, %cst_38 {dimension_numbers = #tpu.dot_dimension_numbers<[1], [0], [0], [1], [0, 0, 1, 1], [], []>} : vector<8x8xf32>, vector<8x8xf32>, vector<8x8xf32> -> vector<8x8xf32>
    %c1_39 = arith.constant 1 : index
    %c0_40 = arith.constant 0 : index
    %c0_41 = arith.constant 0 : index
    %41 = vector.load %arg6[%c1_39, %c0_40, %c0_41] : memref<2x8x8xf32, #tpu.memory_space<vmem>>, vector<1x8x8xf32>
    %42 = vector.shape_cast %41 : vector<1x8x8xf32> to vector<8x8xf32>
    %43 = vector.shape_cast %40 : vector<8x8xf32> to vector<1x8x8xf32>
    tpu.vector_store %arg6[%c1_39, %c0_40, %c0_41], %43 {strides = array<i32>} : memref<2x8x8xf32, #tpu.memory_space<vmem>>, vector<1x8x8xf32>,
    return
  }
  func.func @transform_0(%arg0: i32, %arg1: i32) -> (i32, i32, i32) {
    %c0_i32 = arith.constant 0 : i32
    %c0_i32_0 = arith.constant 0 : i32
    return %arg0, %c0_i32, %arg1 : i32, i32, i32
  }
  func.func @transform_1(%arg0: i32, %arg1: i32) -> (i32, i32, i32, i32) {
    %c0_i32 = arith.constant 0 : i32
    %c0_i32_0 = arith.constant 0 : i32
    %c0_i32_1 = arith.constant 0 : i32
    return %arg0, %c0_i32, %c0_i32_0, %arg1 : i32, i32, i32, i32
  }
  func.func @transform_2(%arg0: i32, %arg1: i32) -> (i32, i32) {
    %c0_i32 = arith.constant 0 : i32
    %c0_i32_0 = arith.constant 0 : i32
    %c0_i32_1 = arith.constant 0 : i32
    return %c0_i32, %c0_i32_0 : i32, i32
  }
  func.func @transform_3(%arg0: i32, %arg1: i32) -> (i32, i32) {
    %c0_i32 = arith.constant 0 : i32
    %c0_i32_0 = arith.constant 0 : i32
    %c0_i32_1 = arith.constant 0 : i32
    return %c0_i32, %c0_i32_0 : i32, i32
  }
  func.func @transform_4(%arg0: i32, %arg1: i32) -> (i32, i32, i32) {
    %c0_i32 = arith.constant 0 : i32
    %c0_i32_0 = arith.constant 0 : i32
    return %arg0, %c0_i32, %arg1 : i32, i32, i32
  }
}

</mosaic_0001>

<bundles_post_ra>
// kernel: tpu_custom_call.1
= control target key start
LH: loop header
LB: loop body
LE: loop exit
PB: predicated region body
PF: predicated region fallthrough
CT: control target
= control target key end

     0   :  { %9 = vsyncpa [#allocation3], 0  ;;  %s1273_s0 = inlined_call_operand.vmem [shape: f32[8,4,4], index: 0, kind: input, shape index: {}]   ;;  %s1274_s1 = inlined_call_operand.vmem [shape: f32[8,3,4,4], index: 1, kind: input, shape index: {}]   ;;  %s1275_s2 = inlined_call_operand.vmem [shape: f32[8,8], index: 2, kind: input, shape index: {}]   ;;  %s1276_s3 = inlined_call_operand.vmem [shape: f32[8,8], index: 3, kind: input, shape index: {}]   ;;  %s1277_s4 = inlined_call_operand.hbm [shape: f32[8,8,8], index: 4, kind: output, shape index: {}]  }
   0x1   :  { %11 = vsyncpa [#allocation3 + $0x1], 0  ;;  %s1104_s15 = smov 0   ;;  %s1106_s16 = smov 0  }
   0x2   :  { %s1108_s17 = smov 0   ;;  %s1110_s18 = smov 0  }
   0x3   :  { %s1112_s19 = smov 0   ;;  %s1114_s20 = smov 0  }
   0x4 LB: > { %s861_s21 = sadd.s32 4294967295, %s1071_s20   ;;  %s862_s22 = sadd.s32 4294967294, %s1071_s20   ;;  %s1071_s20 = sphi %s1114_s20, %s17_s20   ;;  %s1067_s19 = sphi %s1112_s19, %s1284_s19   ;;  %s1063_s18 = sphi %s1110_s18, %s1283_s18   ;;  %s1059_s17 = sphi %s1108_s17, %s1282_s17   ;;  %s1055_s16 = sphi %s1106_s16, %s1281_s16   ;;  %s1051_s15 = sphi %s1104_s15, %s1280_s15  }
   0x5   : > { %s29_s23 = sadd.s32 1, %s1067_s19  ;;  %s136_s24 = sadd.s32 1, %s1059_s17 }
   0x6   : > { %p31_p0 = scmp.ge.s32.totalorder %s29_s23, 4  ;;  %p146_p1 = scmp.ne.s32.totalorder %s1059_s17, %s1055_s16 }
   0x7   : > { %p147_p2 = scmp.eq.s32.totalorder %s861_s21, 3  ;;  %p152_p3 = scmp.ne.s32.totalorder %s1055_s16, %s1051_s15 }
   0x8   : > { %s1286_s23 = smov (%p31_p0, %s29_s23), 0  ;;  %p153_p5 = scmp.eq.s32.totalorder %s862_s22, 3 }
   0x9   : > { %p1144_p4 = por %p147_p2, %p146_p1  ;;  %s131_s26 = ssub.s32 %s1067_s19, %s1286_s23 }
   0xa   : > { %p865_p6 = scmp.ge.s32.totalorder %s1071_s20, 1  ;;  %p134_p7 = scmp.eq.s32.totalorder %s131_s26, 0 }
   0xb   : > { %p1151_p8 = por %p153_p5, %p152_p3  ;;  %p202_p9 = scmp.lt.s32.totalorder %s1071_s20, 5 }
   0xc   : > { %s1157_s28 = scalar_select %p134_p7, %s1059_s17, %s136_s24  }
   0xd   : > { %p203_p10 = pnand %p865_p6, %p202_p9 }
   0xe   : > { %s867_s29 = sshll.u32 (!%p203_p10), %s1063_s18, 1  ;;  %v1163_v0 = vld [vmem:[%s1275_s2] sm:$0xff] (!%p203_p10)  ;;  %v1073_v1 = vmov (!%p203_p10), 0.0   ;;  %vm1074_vm0 = vmmov (!%p203_p10), 0   ;;  %s1075_s10 = smov (!%p203_p10), 4   ;;  %vm274_vm1 = vcmask (!%p203_p10), 31744  }
   0xf   : > { %206 = sbr.rel (%p203_p10) target bundleno = 810 (0x32a), region = 36  ;;  %p241_p11 = scmp.lt.s32.totalorder (!%p203_p10), %s867_s29, 7  ;;  %907 = vmatprep.subr.mxu1 (!%p203_p10), %v1073_v1  ;;  %909 = vmatprep.mubr.msk.f32.mxu1 (!%p203_p10), %vm1074_vm0, %v1073_v1  ;;  %vm283_vm2 = vcmask (!%p203_p10), 64512   ;;  %vm433_vm3 = vcmask (!%p203_p10), 1043456   ;;  %v261_v30 = vld [vmem:[%s1276_s3] sm:$0xff] (!%p203_p10) }
  0x10   : > { %908 = vmatpush3.msra.mxu1 (!%p203_p10), %v1163_v0  ;;  %902 = vmatprep.subr.mxu0 (!%p203_p10), %v1073_v1  ;;  %s237_s24 = sand.u32 (!%p203_p10), 1, %s1055_s16   ;;  %s889_s5 = sshll.u32 (!%p203_p10), %s1063_s18, 8 }
  0x11   : > { %903 = vmatpush3.msra.mxu0 (!%p203_p10), %v1163_v0  ;;  %904 = vmatprep.mubr.msk.f32.mxu0 (!%p203_p10), %vm1074_vm0, %v1073_v1  ;;  %s866_s26 = sshll.u32 (!%p203_p10), %s237_s24, 4  ;;  %s1224_s8 = scalar_lea.hbm (!%p203_p10), %s1277_s4, %s889_s5 }
  0x12   : > { %912 = vmatprep.subr.mxu0 (!%p203_p10), %v1073_v1  ;;  %917 = vmatprep.subr.mxu1 (!%p203_p10), %v1073_v1  ;;  %s1076_s18 = smov (!%p203_p10), [#allocation2]  }
  0x16   : > { %s1288_s29 = smov (!%p241_p11, %s867_s29), 7 }
  0x17   : > { %s932_s6 = smul.u32 12, %s1288_s29  ;;  %s868_s11 = sshll.u32 %s1288_s29, 2 }
  0x18   : > { %s247_s14 = scalar_lea.vmem %s1273_s0, %s868_s11  ;;  %s239_s29 = scalar_lea.vmem [#allocation2], %s866_s26 }
  0x19   : > { %s1178_s9 = scalar_lea.vmem %s1274_s1, %s932_s6  ;;  %v262_v10 = vld [vmem:[%s247_s14] sm:$0xf]  ;;  %v876_v19 = vld [vmem:[%s247_s14 + $0x4] sm:$0xf]  ;;  %s768_s30 = sshll.u32 %s239_s29, 4  ;;  %s1219_s30 = int_to_ptr.vmem [resolvable:$true] %s768_s30 }
  0x1a   : > { %v871_v2 = vld [vmem:[%s1178_s9 + $0x4] sm:$0xf]  ;;  %v872_v3 = vld [vmem:[%s1178_s9 + $0x8] sm:$0xf]  ;;  %v878_v5 = vld [vmem:[%s1178_s9 + $0x10] sm:$0xf] }
  0x1b   : > { %v277_v4 = vsub.f32 %v871_v2, %v872_v3  ;;  %v879_v6 = vld [vmem:[%s1178_s9 + $0x14] sm:$0xf]  ;;  %v269_v8 = vadd.f32 %v872_v3, %v871_v2  ;;  %v263_v11 = vld [vmem:[%s1178_s9] sm:$0xf]  ;;  %v877_v20 = vld [vmem:[%s1178_s9 + $0xc] sm:$0xf] }
  0x1c   : > { %v525_v7 = vsub.f32 %v878_v5, %v879_v6  ;;  %v518_v9 = vadd.f32 %v879_v6, %v878_v5  ;;  %v276_v12 = vsub.f32 %v262_v10, %v263_v11  ;;  %v268_v15 = vadd.f32 %v263_v11, %v262_v10  ;;  %s1227_s9 = scalar_lea.sflag [#allocation3], %s237_s24  ;;  %s997_s11 = sshll.u32 %s1076_s18, 4  ;;  %s998_s11 = int_to_ptr.vmem [resolvable:$false] %s997_s11 }
  0x1d   : > { %279 = vrot.lane.b32.xlu0 %v277_v4, %s1075_s10  ;;  %v524_v21 = vsub.f32 %v876_v19, %v877_v20  ;;  %v517_v22 = vadd.f32 %v877_v20, %v876_v19  ;;  %s999_s12 = scalar_lea.vmem %s998_s11, 512  ;;  %p1000_p1 = scmp.lt.s32.totalorder %s1219_s30, %s998_s11 }
  0x1e   : > { %527 = vrot.lane.b32.xlu1 %v525_v7, %s1075_s10 }
  0x21   : > { %271 = vrot.lane.b32.xlu0 %v269_v8, %s1075_s10 }
  0x22   : > { %520 = vrot.lane.b32.xlu1 %v518_v9, %s1075_s10  ;;  %s993_s10 = scalar_lea.vmem %s1219_s30, 256 }
  0x23   : > { %p994_p12 = scmp.ne.s32.totalorder %s1219_s30, %s993_s10  ;;  %p1001_p2 = scmp.lt.s32.totalorder %s999_s12, %s993_s10 }
  0x25   : > { %p995_p13 = pnand %p994_p12, %p1144_p4  ;;  %p1002_p3 = por %p1001_p2, %p1000_p1 }
  0x27   : > { %p996_p0 = pneg %p995_p13 }
  0x29   : > { %p1003_p5 = pnand %p1002_p3, %p996_p0 }
  0x8f   : > { %v280_v13 = vpop.permute.xlu0 %279 }
  0x90   : > { %v282_v14 = vsel %vm274_vm1, %v276_v12, %v280_v13  ;;  %v528_v18 = vpop.permute.xlu1 %527 }
  0x91   : > { %910 = vmatmul.mubr.msk.f32.vlgmr.msra.gmra.mrb[0].mxu1 %vm283_vm2, %v282_v14  ;;  %v530_v23 = vsel %vm274_vm1, %v524_v21, %v528_v18 }
  0x92   : > { %918 = vmatpush3.msra.mxu1 %v1163_v0  ;;  %919 = vmatprep.mubr.msk.f32.mxu1 %vm1074_vm0, %v1073_v1 }
  0x93   : > { %v272_v16 = vpop.permute.xlu0 %271  ;;  %927 = vmatprep.subr.mxu1 %v1073_v1 }
  0x94   : > { %v275_v17 = vsel %vm274_vm1, %v268_v15, %v272_v16  ;;  %v521_v24 = vpop.permute.xlu1 %520 }
  0x95   : > { %905 = vmatmul.mubr.msk.f32.vlgmr.msra.gmra.mrb[0].mxu0 %vm283_vm2, %v275_v17  ;;  %v523_v25 = vsel %vm274_vm1, %v517_v22, %v521_v24 }
  0x96   : > { %914 = vmatprep.mubr.msk.f32.mxu0 %vm1074_vm0, %v1073_v1  ;;  %920 = vmatmul.mubr.msk.f32.vlgmr.msra.gmra.mrb[2].mxu1 %vm283_vm2, %v523_v25 }
  0x97   : > { %929 = vmatprep.mubr.msk.f32.mxu1 %vm1074_vm0, %v1073_v1 }
 0x164   : > { %v426_v26 = vpop.f32.mrb[0].mxu1 }
 0x165   : > { %v911_v27 = vpop.f32.mrb[1].mxu1  ;;  %v431_v28 = vrot.slane %v426_v26, 4 }
 0x168   : > { %v353_v29 = vpop.f32.mrb[0].mxu0 }
 0x169   : > { %v434_v31 = vsel %vm433_vm3, %v353_v29, %v431_v28  ;;  %v906_v32 = vpop.f32.mrb[1].mxu0  ;;  %v600_v33 = vpop.f32.mrb[2].mxu1 }
 0x16a   : > { %913 = vmatpush3.msra.mxu0 %v434_v31  ;;  %v921_v34 = vpop.f32.mrb[3].mxu1 }
 0x16b   : > { %915 = vmatmul.mubr.msk.f32.vlgmr.msra.gmra.mrb[2].mxu0 %vm283_vm2, %v261_v30  ;;  %922 = vmatprep.subr.mxu0 %v1073_v1 }
 0x16c   : > { %923 = vmatpush3.msra.mxu0 %v1163_v0  ;;  %924 = vmatprep.mubr.msk.f32.mxu0 %vm1074_vm0, %v1073_v1 }
 0x16f   : > { %925 = vmatmul.mubr.msk.f32.vlgmr.msra.gmra.mrb[4].mxu0 %vm283_vm2, %v530_v23 }
 0x23e   : > { %v504_v35 = vpop.f32.mrb[2].mxu0 }
 0x23f   : > { %508 = vst.msk [vmem:[%s239_s29] sm:$0xff] %vm283_vm2, %v504_v35  ;;  %v916_v36 = vpop.f32.mrb[3].mxu0 }
 0x242   : > { %v673_v37 = vpop.f32.mrb[4].mxu0 }
 0x243   : > { %v678_v38 = vrot.slane %v673_v37, 4  ;;  %v926_v39 = vpop.f32.mrb[5].mxu0 }
 0x245   : > { %v680_v40 = vsel %vm433_vm3, %v600_v33, %v678_v38 }
 0x246   : > { %928 = vmatpush3.msra.mxu1 %v680_v40 }
 0x247   : > { %930 = vmatmul.mubr.msk.f32.vlgmr.msra.gmra.mrb[4].mxu1 %vm283_vm2, %v261_v30 }
 0x31a   : > { %v747_v41 = vpop.f32.mrb[4].mxu1 }
 0x31b   : > { %883 = vst.msk [vmem:[%s239_s29 + $0x8] sm:$0xff] %vm283_vm2, %v747_v41  ;;  %v931_v42 = vpop.f32.mrb[5].mxu1 }
 0x31c   : > { %1006 = shalt.err (!%p1003_p5)
}
 0x31d   : > { %s1007_s13 = scalar_lea.hbm %s1224_s8, 256  ;;  %s1011_s22 = scalar_lea.hbm %s1277_s4, 1024 }
 0x31e   : > { %p1008_p6 = scmp.ne.s32.totalorder %s1224_s8, %s1007_s13  ;;  %p1012_p10 = scmp.lt.u32.totalorder %s1224_s8, %s1277_s4 }
 0x31f   : > { %p1013_p11 = scmp.lt.u32.totalorder %s1011_s22, %s1007_s13  ;;  %p1015_p13 = scmp.lt.u32.totalorder %s1007_s13, %s1224_s8 }
 0x320   : > { %p1009_p7 = pnand %p1008_p6, %p1144_p4 }
 0x321   : > { %p1014_p12 = por %p1013_p11, %p1012_p10 }
 0x322   : > { %p1010_p9 = pneg %p1009_p7 }
 0x323   : > { %p1016_p0 = por %p1015_p13, %p1014_p12 }
 0x325   : > { %p1017_p1 = pnand %p1016_p0, %p1010_p9 }
 0x327   : > { %1020 = shalt.err (!%p1017_p1)
}
 0x328   : > { %s1077_s29 = smov 128   ;;  %s1078_s5 = smov 8  }
 0x329   : > { %933 = dma.vmem_to_hbm [thread:$0]  (%p1144_p4), %s1219_s30, 256, %s1224_s8, %s1227_s9, %s1077_s29, %s1077_s29, %s1078_s5  }
 0x32a PF: > { %p939_p2 = scmp.ge.s32.totalorder %s1071_s20, 2  ;;  %s783_s6 = sand.u32 1, %s1051_s15  }
 0x32b   : > { %s784_s7 = scalar_lea.sflag [#allocation3], %s783_s6 }
 0x32c   : > { %p936_p3 = pnand %p939_p2, %p1151_p8 }
 0x32e   : > { %1046 = dma.done.wait (!%p936_p3), %s784_s7, 256  }
 0x32f   : > { %1048 = vsyncadd (!%p936_p3), %s784_s7, 4294967040  ;;  %s17_s20 = sadd.s32 1, %s1071_s20   ;;  %s1280_s15 = smov %s1055_s16 }
 0x330   : > { %p14_p5 = scmp.ge.s32.totalorder %s17_s20, 6   ;;  %s1281_s16 = smov %s1059_s17 }
 0x331   : > { %s1282_s17 = smov %s1157_s28  ;;  %s1283_s18 = smov %s1067_s19 }
 0x332   : > { %s1284_s19 = smov %s1286_s23  ;;  %16 = sbr.rel (!%p14_p5) target bundleno = 4 (0x4), region = 81 }
 0x339   :  { %789 = vsyncpa [#allocation3], 1 }
 0x33a   :  { %791 = vsyncpa [#allocation3 + $0x1], 1 }

</bundles_post_ra>
